<compile_context>
chip_gen: v5e
topology: v5e:2x2
jax: 0.10.0
libtpu: 0.0.40
codegen_flags: <defaults>
</compile_context>

<pallas_src>
import jax
import jax.numpy as jnp
from jax.experimental import pallas as pl
from jax.experimental.pallas import tpu as pltpu


_TARGET_BLOCK_BYTES = 2 << 20    # aim ~2 MiB per x block -> good DMA/compute overlap
_MAX_BLOCK_BYTES    = 4 << 20    # 4x double-buffered (x in + out) stays well under scoped VMEM
_MIN_PIPELINE_BYTES = 2 << 20    # below this a single grid step is fine (overhead dominated)
_XLA_FALLBACK_BYTES = 512 << 10  # below this skip Pallas entirely (launch overhead dominates)


def _add_pe_kernel(x_ref, pe_ref, o_ref):
    # x_ref: [tb, tl]; pe_ref: [8, tl] (row 0 is the PE slab, replicated to 8
    # sublanes in glue to avoid a 1-sublane block). Lane-dense broadcast add.
    o_ref[...] = x_ref[...] + pe_ref[0:1, :]


def _round_down8(n):
    return max(8, (n // 8) * 8)


def learned_bb3d_encoding(x, emb_table, in_F, *, force_pallas=False):
    """Eval-mode forward of Learnedbb3dEncoding.

    x: [B, in_F, N, D]; emb_table: [max_obs_len, D].
    """
    B, F, N, D = x.shape
    assert F == in_F

    # ---- glue (tiny [F, D] op, runs once): reversed lookup + max_norm=1.0 renorm ----
    rev_idx = jnp.arange(in_F - 1, -1, -1)
    rows = emb_table[rev_idx].astype(jnp.float32)                    # [F, D]
    norm = jnp.sqrt(jnp.sum(rows * rows, axis=-1, keepdims=True))
    # PyTorch embedding_renorm_ semantics: rows with ||row||_2 > 1 scaled by 1/(norm+1e-7)
    scale = jnp.where(norm > 1.0, 1.0 / (norm + 1e-7), 1.0)
    pe = (rows * scale).astype(x.dtype)                              # [F, D]

    itemsize = jnp.dtype(x.dtype).itemsize
    L = F * N * D
    total_bytes = B * L * itemsize

    # Tiny problems: a fused XLA add beats a standalone pallas_call (launch +
    # per-step overhead dwarfs the data movement).
    if not force_pallas and total_bytes < _XLA_FALLBACK_BYTES:
        # TODO(synk): training-mode dropout (Bernoulli mask * 1/(1-p)) not emitted.
        return x + pe[None, :, None, :]

    # ---- lane-dense flatten: broadcast pe over agents, fold F*N*D into lanes ----
    pe_row = jnp.broadcast_to(pe[:, None, :], (F, N, D)).reshape(1, L)
    x2 = x.reshape(B, L)
    row_bytes = L * itemsize

    # Unmasked full-lane stores (the big perf lever) require L % 128 == 0.  If L
    # is unaligned we keep the block lane dim == full L (legal; masked stores),
    # unless we must tile L, in which case we pad up to a 128 multiple.
    lane_aligned = (L % 128 == 0)
    need_l_tile = 8 * row_bytes > _MAX_BLOCK_BYTES
    L_pad = L
    if need_l_tile and not lane_aligned:
        L_pad = ((L + 127) // 128) * 128
        x2 = jnp.pad(x2, ((0, 0), (0, L_pad - L)))        # rare path: one extra copy
        pe_row = jnp.pad(pe_row, ((0, 0), (0, L_pad - L)))

    if need_l_tile:
        # Rows alone can't stay under the per-block budget: tile 128-aligned lane chunks too.
        tb = B if B < 8 else 8
        tl = max(128, (_MAX_BLOCK_BYTES // (tb * itemsize)) // 128 * 128)
        tl = min(tl, L_pad)
    else:
        tl = L_pad
        if total_bytes <= _MIN_PIPELINE_BYTES:
            tb = B                      # single step; nothing worth pipelining
        else:
            # Multiple steps so BlockSpec double-buffering overlaps DMA with the
            # add, and so the row axis can be megacore-sharded on v7x.
            tb_target = _round_down8(_TARGET_BLOCK_BYTES // row_bytes)
            tb_cap    = _round_down8(_MAX_BLOCK_BYTES // row_bytes)
            tb_steps  = _round_down8(B // 8)              # >= ~8 grid steps
            tb = min(tb_target, tb_cap, tb_steps)
            tb = min(tb, B) if B >= 8 else B

    grid_rows = pl.cdiv(B, tb)
    grid_l = pl.cdiv(L_pad, tl)

    pe8 = jnp.broadcast_to(pe_row, (8, L_pad))            # 8 sublanes, resident in VMEM

    block_bytes = tb * tl * itemsize
    pe_bytes = 8 * tl * itemsize
    vmem_limit = int(min(32 << 20, max(8 << 20, 4 * block_bytes + 2 * pe_bytes + (4 << 20))))

    cost = pl.CostEstimate(
        flops=B * L,
        transcendentals=0,
        bytes_accessed=(2 * B * L + 8 * L) * itemsize,
    )

    out2 = pl.pallas_call(
        _add_pe_kernel,
        out_shape=jax.ShapeDtypeStruct((B, L_pad), x.dtype),
        grid_spec=pltpu.PrefetchScalarGridSpec(
            num_scalar_prefetch=0,
            grid=(grid_rows, grid_l),
            in_specs=[
                pl.BlockSpec((tb, tl), lambda r, c: (r, c)),
                pl.BlockSpec((8, tl), lambda r, c: (0, c)),   # same block across rows -> stays resident
            ],
            out_specs=pl.BlockSpec((tb, tl), lambda r, c: (r, c)),
        ),
        compiler_params=pltpu.CompilerParams(
            dimension_semantics=("parallel", "parallel"),
            vmem_limit_bytes=vmem_limit,
        ),
        cost_estimate=cost,
        # input_output_aliases={0: 0} only helps when the caller donates x;
        # without donation XLA inserts a defensive copy, so it is left off.
    )(x2, pe8)

    if L_pad != L:
        out2 = out2[:, :L]

    # TODO(synk): training-mode dropout (Bernoulli mask * 1/(1-p)) not emitted; eval-mode identity.
    return out2.reshape(B, F, N, D)


def reference(x, emb_table, in_F):
    rev_idx = jnp.arange(in_F - 1, -1, -1)
    rows = emb_table[rev_idx].astype(jnp.float32)
    norm = jnp.sqrt(jnp.sum(rows * rows, axis=-1, keepdims=True))
    scale = jnp.where(norm > 1.0, 1.0 / (norm + 1e-7), 1.0)
    pe = (rows * scale).astype(x.dtype)
    return x + pe[None, :, None, :]


if __name__ == "__main__":
    # Small shapes consistent with the forward: B=2, in_F=8, N=3 agents, d_model=32
    B, in_F, N, d_model = 2, 8, 3, 32
    max_obs_len = 200

    key = jax.random.PRNGKey(0)
    kx, kw, kx2 = jax.random.split(key, 3)
    x = jax.random.normal(kx, (B, in_F, N, d_model), dtype=jnp.float32)
    # nn.Embedding default init: N(0, 1) (rows have norm > 1, so renorm is exercised)
    emb_table = jax.random.normal(kw, (max_obs_len, d_model), dtype=jnp.float32)

    # 1) Demo-size forward, forced through the Pallas kernel (single grid step).
    out = learned_bb3d_encoding(x, emb_table, in_F, force_pallas=True)
    out = jax.block_until_ready(out)
    ref = reference(x, emb_table, in_F)
    assert out.shape == (B, in_F, N, d_model)
    assert jnp.allclose(out, ref, atol=1e-5, rtol=1e-5)

    # 2) Mid-size batch: exercises the multi-step pipelined grid (8 row tiles,
    #    megacore-shardable on v7x).
    B2 = 1024
    xl = jax.random.normal(kx2, (B2, in_F, N, d_model), dtype=jnp.float32)
    out2 = learned_bb3d_encoding(xl, emb_table, in_F)
    out2 = jax.block_until_ready(out2)
    ref2 = reference(xl, emb_table, in_F)
    assert jnp.allclose(out2, ref2, atol=1e-5, rtol=1e-5)

    print("KERNEL_OK")
</pallas_src>

<mosaic_0001>
module attributes {stable_mosaic.version = 11 : i64} {
  func.func @_add_pe_kernel(%arg0: i32, %arg1: i32, %arg2: memref<2x768xf32, #tpu.memory_space<vmem>>, %arg3: memref<8x768xf32, #tpu.memory_space<vmem>>, %arg4: memref<2x768xf32, #tpu.memory_space<vmem>>) attributes {dimension_semantics = [#tpu.dimension_semantics<parallel>, #tpu.dimension_semantics<parallel>], iteration_bounds = array<i64: 1, 1>, scalar_prefetch = 0 : i64, scratch_operands = 0 : i64, tpu.core_type = #tpu.core_type<tc>, window_params = [{transform_indices = @transform_0, window_bounds = array<i64: 2, 768>}, {transform_indices = @transform_1, window_bounds = array<i64: 8, 768>}, {transform_indices = @transform_2, window_bounds = array<i64: 2, 768>}]} {
    %c0 = arith.constant 0 : index
    %c0_0 = arith.constant 0 : index
    %0 = vector.load %arg2[%c0, %c0_0] : memref<2x768xf32, #tpu.memory_space<vmem>>, vector<2x768xf32>
    %c0_1 = arith.constant 0 : index
    %c0_2 = arith.constant 0 : index
    %1 = vector.load %arg3[%c0_1, %c0_2] : memref<8x768xf32, #tpu.memory_space<vmem>>, vector<1x768xf32>
    %2 = vector.broadcast %1 : vector<1x768xf32> to vector<2x768xf32>
    %3 = arith.addf %0, %2 : vector<2x768xf32>
    %c0_3 = arith.constant 0 : index
    %c0_4 = arith.constant 0 : index
    %4 = vector.load %arg4[%c0_3, %c0_4] : memref<2x768xf32, #tpu.memory_space<vmem>>, vector<2x768xf32>
    tpu.vector_store %arg4[%c0_3, %c0_4], %3 {strides = array<i32>} : memref<2x768xf32, #tpu.memory_space<vmem>>, vector<2x768xf32>,
    return
  }
  func.func @transform_0(%arg0: i32, %arg1: i32) -> (i32, i32) {
    %c0_i32 = arith.constant 0 : i32
    return %arg0, %arg1 : i32, i32
  }
  func.func @transform_1(%arg0: i32, %arg1: i32) -> (i32, i32) {
    %c0_i32 = arith.constant 0 : i32
    %c0_i32_0 = arith.constant 0 : i32
    return %c0_i32, %arg1 : i32, i32
  }
  func.func @transform_2(%arg0: i32, %arg1: i32) -> (i32, i32) {
    %c0_i32 = arith.constant 0 : i32
    return %arg0, %arg1 : i32, i32
  }
}

</mosaic_0001>

<bundles_post_ra>
// kernel: tpu_custom_call.1
= control target key start
LH: loop header
LB: loop body
LE: loop exit
PB: predicated region body
PF: predicated region fallthrough
CT: control target
= control target key end

     0   :  { %7 = vsyncpa [#allocation3], 0  ;;  %s197_s0 = inlined_call_operand.hbm [shape: f32[2,768], index: 0, kind: input, shape index: {}]   ;;  %s198_s1 = inlined_call_operand.hbm [shape: f32[8,768], index: 1, kind: input, shape index: {}]   ;;  %s199_s2 = inlined_call_operand.hbm [shape: f32[2,768], index: 2, kind: output, shape index: {}]  }
   0x1   :  { %8 = vsyncpa [#allocation6], 0 }
   0x2   :  { %9 = vsyncpa [#allocation4], 0  ;;  %s15_s11 = sshll.u32 %s197_s0, 4  ;;  %s168_s12 = smov [#allocation2]   ;;  %s16_s11 = int_to_ptr.hbm [resolvable:$true] %s15_s11 }
   0x3   :  { %s17_s13 = sshll.u32 %s168_s12, 4  ;;  %s26_s16 = sshll.u32 %s198_s1, 4  ;;  %s18_s13 = int_to_ptr.vmem [resolvable:$true] %s17_s13  ;;  %s27_s16 = int_to_ptr.hbm [resolvable:$true] %s26_s16 }
   0x4   :  { %20 = dma.hbm_to_vmem [thread:$0]  %s16_s11, 192, %s18_s13, [#allocation3]  }
   0x5   :  { %s169_s17 = smov [#allocation5]  }
   0x6   :  { %s28_s18 = sshll.u32 %s169_s17, 4  ;;  %s29_s18 = int_to_ptr.vmem [resolvable:$true] %s28_s18 }
   0x7   :  { %31 = dma.hbm_to_vmem [thread:$0]  %s27_s16, 768, %s29_s18, [#allocation6]  }
   0x8   :  { %162 = dma.done.wait [#allocation3], 192  }
   0x9   :  { %163 = vsyncadd [#allocation3], 4294967104 }
   0xa   :  { %164 = dma.done.wait [#allocation6], 768  }
   0xb   :  { %165 = vsyncadd [#allocation6], 4294966528  ;;  %v42_v0 = vld [vmem:[#allocation5] ss:$8 sm:$0xf]  ;;  %vm56_vm0 = vcmask 1041408  }
   0xc   :  { %v43_v1 = vld [vmem:[#allocation5] ss:$8 sm:$0x30]  ;;  %vm58_vm1 = vcmask 1045508   ;;  %vm60_vm2 = vcmask 1043456   ;;  %v40_v12 = vld [vmem:[#allocation2] sm:$0xff] }
   0xd   :  { %v44_v2 = vor.u32 %v43_v1, %v42_v0  ;;  %v41_v13 = vld [vmem:[#allocation2 + $0x8] sm:$0xf]  ;;  %s170_s0 = smov [#allocation7]   ;;  %s76_s21 = sshll.u32 %s199_s2, 4  ;;  %s77_s21 = int_to_ptr.hbm [resolvable:$true] %s76_s21 }
   0xe   :  { %s74_s1 = sshll.u32 %s170_s0, 4  ;;  %s75_s1 = int_to_ptr.vmem [resolvable:$true] %s74_s1 }
   0xf   :  { %v46_v3 = vperm.slane %v44_v2, 0  ;;  %v47_v4 = vperm.slane %v44_v2, 1  ;;  %v48_v5 = vperm.slane %v44_v2, 2  ;;  %v49_v6 = vperm.slane %v44_v2, 3 }
  0x10   :  { %v50_v7 = vperm.slane %v44_v2, 4  ;;  %v51_v8 = vperm.slane %v44_v2, 5 }
  0x11   :  { %v52_v9 = vrot.slane %v47_v4, 6  ;;  %v53_v10 = vrot.slane %v48_v5, 4  ;;  %v54_v11 = vrot.slane %v49_v6, 2 }
  0x12   :  { %v55_v14 = vrot.slane %v51_v8, 6 }
  0x13   :  { %v57_v15 = vsel %vm56_vm0, %v46_v3, %v52_v9  ;;  %v59_v16 = vsel %vm58_vm1, %v53_v10, %v54_v11 }
  0x14   :  { %v61_v17 = vsel %vm60_vm2, %v57_v15, %v59_v16  ;;  %v62_v18 = vsel %vm56_vm0, %v50_v7, %v55_v14 }
  0x15   :  { %v65_v19 = vadd.f32 %v61_v17, %v40_v12  ;;  %v66_v20 = vadd.f32 %v62_v18, %v41_v13 }
  0x17   :  { %67 = vst [vmem:[#allocation7] sm:$0xff] %v65_v19 }
  0x18   :  { %68 = vst [vmem:[#allocation7 + $0x8] sm:$0xf] %v66_v20 }
  0x19   :  { %79 = dma.vmem_to_hbm [thread:$0]  %s75_s1, 192, %s77_s21, [#allocation4]  }
  0x1a   :  { %166 = dma.done.wait [#allocation4], 192  }
  0x1b   :  { %167 = vsyncadd [#allocation4], 4294967104 }
  0x1c   :  { %84 = vsyncpa [#allocation3], 1 }
  0x1d   :  { %85 = vsyncpa [#allocation6], 1 }
  0x1e   :  { %86 = vsyncpa [#allocation4], 1 }

</bundles_post_ra>
